<compile_context>
chip_gen: v7x
topology: tpu7x:2x2x1
jax: 0.10.0
libtpu: 0.0.40
codegen_flags: <defaults>
</compile_context>

<pallas_src>
import jax
import jax.numpy as jnp
from jax.experimental import pallas as pl
from jax.experimental.pallas import tpu as pltpu


def _relu6_nan_kernel(x_ref, o_ref):
    x = x_ref[...]
    zero = jnp.zeros((), x.dtype)
    y = jnp.minimum(jnp.maximum(x, zero), jnp.asarray(6.0, x.dtype))  # relu -> clip(max=6)
    o_ref[...] = jnp.where(jnp.isnan(x), zero, y)                     # nan_to_num(0.0)


def _relu6_kernel(x_ref, o_ref):
    x = x_ref[...]
    y = jnp.minimum(jnp.maximum(x, jnp.zeros((), x.dtype)),
                    jnp.asarray(6.0, x.dtype))
    o_ref[...] = y                                                    # NaNs propagate (nan=False)


_LANE = 128
# ~2 MiB per tile: measured 512x1024 f32 tiles reach ~85% of HBM roofline, and
# 2 x (in + out) double-buffered tiles stay far below v7x's 64 MiB VMEM and
# v5e's scoped-VMEM budget once vmem_limit_bytes is raised.
_TARGET_TILE_BYTES = 2 << 20


def _choose_width(n):
    """Widest lane-dense width (multiple of 128) that divides n; else 128 + tiny pad."""
    for cand in (8192, 4096, 2048, 1024, 512, 256, 128):
        if n % cand == 0:
            return cand
    return _LANE


def my_activation(x, *, nan=True, act='relu6'):
    """Pallas equivalent of MyActivation(nan=..., act='relu6').forward."""
    assert act == 'relu6', "only the relu6 branch is implemented"
    # TODO(synk): gelu6 branch (nn.GELU + clip) not implemented here.

    orig_shape = x.shape
    dtype = x.dtype
    n = x.size
    if n == 0:
        return x

    itemsize = jnp.dtype(dtype).itemsize
    # Native sublane packing: 8 rows for 32-bit, 16 for 16-bit, 32 for 8-bit dtypes.
    sublanes = max(8, 32 // max(1, itemsize))

    width = _choose_width(n)
    flat = x.reshape(-1)
    pad = (-n) % width
    if pad:
        # Rare (NCHW conv activations are essentially always multiples of 128);
        # pads by < width elements instead of copying whole tiles.
        flat = jnp.pad(flat, (0, pad))
    rows = flat.shape[0] // width
    x2d = flat.reshape(rows, width)

    # Block rows: ~_TARGET_TILE_BYTES per tile, multiple of the native sublane
    # packing; if the whole array is smaller than one tile, use the full extent
    # (a block equal to the full dim is always a legal block shape).
    block_rows = (_TARGET_TILE_BYTES // (width * itemsize)) // sublanes * sublanes
    block_rows = max(block_rows, sublanes)
    if block_rows >= rows:
        block_rows = rows
    grid = (pl.cdiv(rows, block_rows),)   # ragged last block is masked by Pallas

    tile_bytes = block_rows * width * itemsize
    # Cover 2 buffers x (input tile + output tile) with headroom; clamp so we
    # never ask for more than is sensible on v7x's 64 MiB physical VMEM.
    vmem_limit = int(min(64 << 20, max(16 << 20, 6 * tile_bytes)))

    kernel = _relu6_nan_kernel if nan else _relu6_kernel

    out2d = pl.pallas_call(
        kernel,
        out_shape=jax.ShapeDtypeStruct((rows, width), dtype),
        grid_spec=pltpu.PrefetchScalarGridSpec(
            num_scalar_prefetch=0,
            grid=grid,
            in_specs=[pl.BlockSpec((block_rows, width), lambda i: (i, 0))],
            out_specs=pl.BlockSpec((block_rows, width), lambda i: (i, 0)),
        ),
        compiler_params=pltpu.CompilerParams(
            dimension_semantics=("parallel",),
            vmem_limit_bytes=vmem_limit,
        ),
        # Elementwise: output may reuse the input HBM buffer (in-place when the
        # caller donates x; XLA inserts a defensive copy otherwise).
        input_output_aliases={0: 0},
    )(x2d)

    out_flat = out2d.reshape(-1)
    if pad:
        out_flat = out_flat[:n]
    return out_flat.reshape(orig_shape)


if __name__ == "__main__":
    key = jax.random.PRNGKey(0)
    # NCHW input, small shape: batch=2, channels=4, spatial=16x16
    x = jax.random.normal(key, (2, 4, 16, 16), dtype=jnp.float32) * 5.0
    # exercise the nan / clip / relu paths
    x = x.at[0, 0, 0, 0].set(jnp.nan)
    x = x.at[1, 3, 5, 7].set(100.0)
    x = x.at[0, 1, 2, 3].set(-50.0)

    # plain-JAX reference (computed before the kernel call)
    ref = jnp.minimum(jnp.maximum(x, 0.0), 6.0)
    ref = jnp.where(jnp.isnan(x), 0.0, ref)
    ref = jax.block_until_ready(ref)

    y = jax.block_until_ready(my_activation(x))

    assert y.shape == x.shape and y.dtype == x.dtype
    assert not bool(jnp.any(jnp.isnan(y)))
    assert bool(jnp.allclose(y, ref))

    print("KERNEL_OK")
</pallas_src>

<mosaic_0001>
module attributes {stable_mosaic.version = 11 : i64} {
  func.func @_relu6_nan_kernel(%arg0: i32, %arg1: memref<1x2048xf32, #tpu.memory_space<vmem>>, %arg2: memref<1x2048xf32, #tpu.memory_space<vmem>>) attributes {dimension_semantics = [#tpu.dimension_semantics<parallel>], iteration_bounds = array<i64: 1>, scalar_prefetch = 0 : i64, scratch_operands = 0 : i64, tpu.core_type = #tpu.core_type<tc>, window_params = [{transform_indices = @transform_0, window_bounds = array<i64: 1, 2048>}, {transform_indices = @transform_1, window_bounds = array<i64: 1, 2048>}]} {
    %c0 = arith.constant 0 : index
    %c0_0 = arith.constant 0 : index
    %0 = vector.load %arg1[%c0, %c0_0] : memref<1x2048xf32, #tpu.memory_space<vmem>>, vector<1x2048xf32>
    %cst = arith.constant 0.000000e+00 : f32
    %1 = vector.broadcast %cst : f32 to vector<1x2048xf32>
    %2 = arith.maximumf %0, %1 : vector<1x2048xf32>
    %cst_1 = arith.constant 6.000000e+00 : f32
    %3 = vector.broadcast %cst_1 : f32 to vector<1x2048xf32>
    %4 = arith.minimumf %2, %3 : vector<1x2048xf32>
    %5 = arith.cmpf one, %0, %0 : vector<1x2048xf32>
    %cst_2 = arith.constant 0.000000e+00 : f32
    %6 = vector.broadcast %cst_2 : f32 to vector<1x2048xf32>
    %7 = arith.select %5, %6, %4 : vector<1x2048xi1>, vector<1x2048xf32>
    %c0_3 = arith.constant 0 : index
    %c0_4 = arith.constant 0 : index
    %8 = vector.load %arg2[%c0_3, %c0_4] : memref<1x2048xf32, #tpu.memory_space<vmem>>, vector<1x2048xf32>
    tpu.vector_store %arg2[%c0_3, %c0_4], %7 {strides = array<i32>} : memref<1x2048xf32, #tpu.memory_space<vmem>>, vector<1x2048xf32>,
    return
  }
  func.func @transform_0(%arg0: i32) -> (i32, i32) {
    %c0_i32 = arith.constant 0 : i32
    %c0_i32_0 = arith.constant 0 : i32
    return %arg0, %c0_i32 : i32, i32
  }
  func.func @transform_1(%arg0: i32) -> (i32, i32) {
    %c0_i32 = arith.constant 0 : i32
    %c0_i32_0 = arith.constant 0 : i32
    return %arg0, %c0_i32 : i32, i32
  }
}

</mosaic_0001>

<bundles_post_ra>
// kernel: tpu_custom_call.1
= control target key start
LH: loop header
LB: loop body
LE: loop exit
PB: predicated region body
PF: predicated region fallthrough
CT: control target
= control target key end

     0   :  { %6 = vsyncpa [#allocation3], 0  ;;  %s134_s0 = inlined_call_operand.hbm [shape: f32[1,2048], index: 0, kind: input, shape index: {}, may-alias: {0,1}]   ;;  %s135_s1 = inlined_call_operand.hbm [shape: f32[1,2048], index: 1, kind: output, shape index: {}, may-alias: {0,1}]  }
   0x1   :  { %7 = vsyncpa [#allocation4], 0  ;;  %s98_s6 = smov [#allocation2]   ;;  %s50_s10 = scalar_lea.hbm %s134_s0, 256 }
   0x2   :  { %s14_s7 = sshll.u32 %s98_s6, 4  ;;  %p51_p0 = scmp.ne.s32.totalorder %s134_s0, %s50_s10  ;;  %s15_s7 = int_to_ptr.vmem [resolvable:$true] %s14_s7 }
   0x3   :  { %p54_p1 = scmp.lt.u32.totalorder %s50_s10, %s134_s0 }
   0x5   :  { %p56_p2 = pnand %p54_p1, %p51_p0 }
   0x7   :  { %59 = shalt.err (!%p56_p2)
}
   0x8   :  { %s60_s15 = scalar_lea.vmem %s15_s7, 256  ;;  %p65_p4 = scmp.lt.s32.totalorder %s15_s7, %s15_s7 }
   0x9   :  { %p61_p3 = scmp.ne.s32.totalorder %s15_s7, %s60_s15  ;;  %p66_p5 = scmp.lt.s32.totalorder %s60_s15, %s60_s15 }
   0xb   :  { %p67_p6 = por %p66_p5, %p65_p4 }
   0xd   :  { %p68_p7 = pnand %p67_p6, %p61_p3 }
   0xf   :  { %71 = shalt.err (!%p68_p7)
}
  0x10   :  { %17 = dma.hbm_to_vmem [thread:$0]  %s134_s0, 256, %s15_s7, [#allocation3]  }
  0x11   :  { %94 = dma.done.wait [#allocation3], 256  }
  0x12   :  { %95 = vsyncadd [#allocation3], 4294967040  ;;  %v21_v0 = vld [vmem:[#allocation2] sm:$0xff]  ;;  %v22_v1 = vld [vmem:[#allocation2 + $0x8] sm:$0xff]  ;;  %s99_s18 = smov [#allocation5]  }
  0x13   :  { %v23_v2 = vmax.f32 %v21_v0, 0.0  ;;  %v24_v3 = vmax.f32 %v22_v1, 0.0  ;;  %s39_s19 = sshll.u32 %s99_s18, 4  ;;  %vm27_vm0 = vcmp.ne.f32.partialorder %v21_v0, %v21_v0  ;;  %vm28_vm1 = vcmp.ne.f32.partialorder %v22_v1, %v22_v1  ;;  %s40_s19 = int_to_ptr.vmem [resolvable:$true] %s39_s19 }
  0x14   :  { %s72_s20 = scalar_lea.vmem %s40_s19, 256  ;;  %p77_p9 = scmp.lt.s32.totalorder %s40_s19, %s40_s19 }
  0x15   :  { %v25_v4 = vmin.f32 %v23_v2, 6.0  ;;  %v26_v5 = vmin.f32 %v24_v3, 6.0  ;;  %p73_p8 = scmp.ne.s32.totalorder %s40_s19, %s72_s20  ;;  %p78_p10 = scmp.lt.s32.totalorder %s72_s20, %s72_s20 }
  0x17   :  { %v29_v6 = vsel %vm27_vm0, 0.0, %v25_v4  ;;  %v30_v7 = vsel %vm28_vm1, 0.0, %v26_v5  ;;  %p79_p11 = por %p78_p10, %p77_p9 }
  0x18   :  { %31 = vst [vmem:[#allocation5] sm:$0xff] %v29_v6  ;;  %32 = vst [vmem:[#allocation5 + $0x8] sm:$0xff] %v30_v7 }
  0x19   :  { %p80_p12 = pnand %p79_p11, %p73_p8 }
  0x1b   :  { %83 = shalt.err (!%p80_p12)
}
  0x1c   :  { %s84_s22 = scalar_lea.hbm %s135_s1, 256 }
  0x1d   :  { %p85_p13 = scmp.ne.s32.totalorder %s135_s1, %s84_s22  ;;  %p88_p0 = scmp.lt.u32.totalorder %s84_s22, %s135_s1 }
  0x1f   :  { %p90_p1 = pnand %p88_p0, %p85_p13 }
  0x21   :  { %93 = shalt.err (!%p90_p1)
}
  0x22   :  { %42 = dma.vmem_to_hbm [thread:$0]  %s40_s19, 256, %s135_s1, [#allocation4]  }
  0x23   :  { %96 = dma.done.wait [#allocation4], 256  }
  0x24   :  { %97 = vsyncadd [#allocation4], 4294967040 }
  0x25   :  { %46 = vsyncpa [#allocation3], 1 }
  0x26   :  { %47 = vsyncpa [#allocation4], 1 }

</bundles_post_ra>
